<compile_context>
chip_gen: v6e
topology: v6e:2x2x1
jax: 0.10.0
libtpu: 0.0.40
codegen_flags: <defaults>
</compile_context>

<pallas_src>
import math
from functools import partial

import jax
import jax.numpy as jnp
from jax.experimental import pallas as pl
from jax.experimental.pallas import tpu as pltpu

_LOG_EPS = math.log(1e-7)


def _jsd_kernel(pred_ref, labels_ref, out_ref, *, n_rows, w0, w1, scale):
    # pred_ref:   VMEM (T, C) logits (native dtype)
    # labels_ref: VMEM (T, 1) int32 class ids
    # out_ref:    VMEM (1, 1) f32 accumulator (resident across the grid axis)
    pid = pl.program_id(0)
    last = pl.num_programs(0) - 1
    T, C = pred_ref.shape

    logits = pred_ref[...].astype(jnp.float32)                       # (T, C)

    # Mask rows past the true batch size (remainder tile). Sanitize padded
    # rows so exp/log stay finite, then zero their contribution at the end.
    row_ids = jax.lax.broadcasted_iota(jnp.int32, (T, 1), 0) + pid * T
    valid = row_ids < n_rows                                         # (T, 1)
    logits = jnp.where(valid, logits, 0.0)

    # Softmax over classes (lane axis). log(p) is derived analytically so we
    # pay exp (per element) + one log + one reciprocal per row.
    m = jnp.max(logits, axis=1, keepdims=True)                       # (T, 1)
    shifted = logits - m
    e = jnp.exp(shifted)                                             # EUP
    s = jnp.sum(e, axis=1, keepdims=True)                            # (T, 1)
    inv_s = pl.reciprocal(s)                                         # exact
    p = e * inv_s                                                    # (T, C)
    log_p_raw = shifted - jnp.log(s)                                 # exact log softmax (<= 0)
    log_p_cl = jnp.maximum(log_p_raw, _LOG_EPS)    # == log(clamp(p, 1e-7))

    labels = labels_ref[...]                                         # (T, 1)
    class_ids = jax.lax.broadcasted_iota(jnp.int32, (T, C), 1)
    onehot = (class_ids == labels).astype(jnp.float32)               # (T, C)

    # mean_log at NON-label classes, without a second full (T,C) log:
    #   log(clip(w1*p, 1e-7, 1)) = max(log(w1) + log(p), log(1e-7))
    # (w1*p < 1 so the upper clip is inactive; log_p_raw <= 0 guarantees it.)
    mlog_nl = jnp.maximum(log_p_raw + jnp.float32(math.log(w1)), _LOG_EPS)

    # Label-column quantities (per row).
    p_lab = jnp.sum(onehot * p, axis=1, keepdims=True)               # (T, 1)
    mlog_nl_lab = jnp.sum(onehot * mlog_nl, axis=1, keepdims=True)   # (T, 1)
    mean_lab = jnp.clip(w0 + w1 * p_lab, 1e-7, 1.0)                  # (T, 1)
    mean_log_lab = jnp.log(mean_lab)                                 # only per-row log

    # KL(onehot || mean): hot class contributes -mean_log[label].
    kl_onehot = -mean_log_lab                                        # (T, 1)
    # KL(p || mean): full-row sum with the label column corrected.
    kl_pred = (jnp.sum(p * (log_p_cl - mlog_nl), axis=1, keepdims=True)
               + p_lab * (mlog_nl_lab - mean_log_lab))               # (T, 1)

    per_row = (w0 * scale) * kl_onehot + (w1 * scale) * kl_pred      # (T, 1)
    per_row = jnp.where(valid, per_row, 0.0)
    partial_sum = jnp.sum(per_row, axis=0, keepdims=True)            # (1, 1)

    @pl.when(pid == 0)
    def _():
        out_ref[...] = jnp.zeros_like(out_ref)

    out_ref[...] += partial_sum

    @pl.when(pid == last)
    def _():
        out_ref[...] = out_ref[...] * jnp.float32(1.0 / n_rows)


def _choose_tile_n(n, c, itemsize):
    if n <= 8:
        return n
    # Target ~4 MiB per pred block; double-buffered copies still sit well
    # under every generation's scoped-VMEM default (incl. v7x's 64 MiB).
    target_rows = (4 * 1024 * 1024) // (itemsize * max(c, 1))
    t = max(8, min(n, target_rows, 16384))
    return max(8, (t // 8) * 8)


def jensen_shannon_divergence_weighted_scaled(pred, labels, weights, tile_n=None):
    """pred: (N, C) logits (any float dtype), labels: (N,) int, weights: (w0, w1)."""
    if isinstance(pred, (list, tuple)):
        assert len(pred) == 1, "multi-pred JSD not implemented (see TODO)"
        pred = pred[0]
    assert abs(1.0 - float(sum(weights))) < 1e-3
    n, c = pred.shape
    w0, w1 = float(weights[0]), float(weights[1])
    scale = -1.0 / ((1.0 - w0) * math.log(1.0 - w0))

    itemsize = jnp.dtype(pred.dtype).itemsize
    if tile_n is None:
        tile_n = _choose_tile_n(n, c, itemsize)
    grid = (pl.cdiv(n, tile_n),)

    labels2d = labels.astype(jnp.int32).reshape(n, 1)

    kernel = partial(_jsd_kernel, n_rows=n, w0=w0, w1=w1, scale=scale)

    cost = pl.CostEstimate(
        flops=14 * n * c,
        transcendentals=n * c + 3 * n,
        bytes_accessed=n * c * itemsize + n * 4 + 4,
    )

    # Explicit (modest) VMEM budget: double-buffered pred + labels tiles plus
    # headroom. Kept well under v7x's 64 MiB physical VMEM.
    vmem_needed = 2 * (tile_n * c * itemsize) + 2 * (tile_n * 4) + (1 << 20)
    vmem_limit = int(min(max(vmem_needed, 16 * 1024 * 1024), 48 * 1024 * 1024))

    out = pl.pallas_call(
        kernel,
        out_shape=jax.ShapeDtypeStruct((1, 1), jnp.float32),
        grid=grid,
        in_specs=[
            pl.BlockSpec((tile_n, c), lambda i: (i, 0)),   # pred logits tile
            pl.BlockSpec((tile_n, 1), lambda i: (i, 0)),   # labels tile
        ],
        out_specs=pl.BlockSpec((1, 1), lambda i: (0, 0)),  # resident accumulator
        compiler_params=pltpu.CompilerParams(
            dimension_semantics=("arbitrary",),
            vmem_limit_bytes=vmem_limit,
        ),
        cost_estimate=cost,
    )(pred, labels2d)
    return out[0, 0]


def _jsd_reference(pred, labels, weights):
    # Pure-JAX reference mirroring the PyTorch module (single-pred case).
    w0, w1 = float(weights[0]), float(weights[1])
    scale = -1.0 / ((1.0 - w0) * math.log(1.0 - w0))
    p = jax.nn.softmax(pred.astype(jnp.float32), axis=1)
    onehot = jax.nn.one_hot(labels, pred.shape[1], dtype=jnp.float32)
    mean_d = w0 * onehot + w1 * p
    mean_log = jnp.log(jnp.clip(mean_d, 1e-7, 1.0))

    def kl(d, w):
        pos = d * (jnp.log(jnp.clip(d, 1e-7, None)) - mean_log)
        out = jnp.where(d > 0, pos, 0.0)
        return (w * jnp.sum(out, axis=1)).mean()

    return kl(onehot, w0 * scale) + kl(p, w1 * scale)


if __name__ == "__main__":
    key = jax.random.PRNGKey(0)
    k_pred, k_lab, k_pred2, k_lab2 = jax.random.split(key, 4)

    weights = (0.3, 0.7)   # [label weight, pred weight], sums to 1

    # Case 1: N=20, tile_n=8 -> multi-tile grid with a remainder tile
    # (exercises the accumulator + row-masking path).
    N, C = 20, 32
    pred = jax.random.normal(k_pred, (N, C), dtype=jnp.float32)
    labels = jax.random.randint(k_lab, (N,), 0, C, dtype=jnp.int32)
    out = jensen_shannon_divergence_weighted_scaled(pred, labels, weights, tile_n=8)
    out = jax.block_until_ready(out)
    ref = _jsd_reference(pred, labels, weights)
    assert jnp.allclose(out, ref, atol=1e-5, rtol=1e-5), (out, ref)

    # Case 2: default tile selection, single-tile grid.
    N2, C2 = 16, 128
    pred2 = jax.random.normal(k_pred2, (N2, C2), dtype=jnp.float32)
    labels2 = jax.random.randint(k_lab2, (N2,), 0, C2, dtype=jnp.int32)
    out2 = jensen_shannon_divergence_weighted_scaled(pred2, labels2, weights)
    out2 = jax.block_until_ready(out2)
    ref2 = _jsd_reference(pred2, labels2, weights)
    assert jnp.allclose(out2, ref2, atol=1e-5, rtol=1e-5), (out2, ref2)

    print("KERNEL_OK")
</pallas_src>

<mosaic_0001>
module attributes {stable_mosaic.version = 11 : i64} {
  func.func @_jsd_kernel(%arg0: i32, %arg1: memref<8x32xf32, #tpu.memory_space<vmem>>, %arg2: memref<8x1xi32, #tpu.memory_space<vmem>>, %arg3: memref<1x1xf32, #tpu.memory_space<vmem>>) attributes {dimension_semantics = [#tpu.dimension_semantics<arbitrary>], iteration_bounds = array<i64: 3>, scalar_prefetch = 0 : i64, scratch_operands = 0 : i64, tpu.core_type = #tpu.core_type<tc>, window_params = [{transform_indices = @transform_0, window_bounds = array<i64: 8, 32>}, {transform_indices = @transform_1, window_bounds = array<i64: 8, 1>}, {pipeline_mode = #tpu.pipeline_mode<synchronous>, transform_indices = @transform_2, window_bounds = array<i64: 1, 1>}]} {
    %c0 = arith.constant 0 : index
    %c0_0 = arith.constant 0 : index
    %0 = vector.load %arg1[%c0, %c0_0] : memref<8x32xf32, #tpu.memory_space<vmem>>, vector<8x32xf32>
    %1 = tpu.iota {dimensions = array<i32: 0>} : vector<8x1xi32>
    %c8_i32 = arith.constant 8 : i32
    %2 = arith.muli %arg0, %c8_i32 : i32
    %3 = vector.broadcast %2 : i32 to vector<8x1xi32>
    %4 = arith.addi %1, %3 : vector<8x1xi32>
    %c20_i32 = arith.constant 20 : i32
    %5 = vector.broadcast %c20_i32 : i32 to vector<8x1xi32>
    %6 = arith.cmpi slt, %4, %5 : vector<8x1xi32>
    %cst = arith.constant 0.000000e+00 : f32
    %7 = vector.shape_cast %6 : vector<8x1xi1> to vector<8x1xi1>
    %8 = vector.broadcast %7 : vector<8x1xi1> to vector<8x32xi1>
    %9 = vector.broadcast %cst : f32 to vector<8x32xf32>
    %10 = arith.select %8, %0, %9 : vector<8x32xi1>, vector<8x32xf32>
    %cst_1 = arith.constant dense<0xFF800000> : vector<8xf32>
    %11 = vector.multi_reduction <maximumf>, %10, %cst_1 [1] : vector<8x32xf32> to vector<8xf32>
    %12 = vector.shape_cast %11 : vector<8xf32> to vector<8x1xf32>
    %13 = vector.broadcast %12 : vector<8x1xf32> to vector<8x32xf32>
    %14 = arith.subf %10, %13 : vector<8x32xf32>
    %15 = math.exp %14 : vector<8x32xf32>
    %cst_2 = arith.constant dense<0.000000e+00> : vector<8xf32>
    %16 = vector.multi_reduction <add>, %15, %cst_2 [1] : vector<8x32xf32> to vector<8xf32>
    %17 = vector.shape_cast %16 : vector<8xf32> to vector<8x1xf32>
    %18 = tpu.reciprocal %17 : vector<8x1xf32> -> vector<8x1xf32>
    %19 = vector.broadcast %18 : vector<8x1xf32> to vector<8x32xf32>
    %20 = arith.mulf %15, %19 : vector<8x32xf32>
    %21 = math.log %17 : vector<8x1xf32>
    %22 = vector.broadcast %21 : vector<8x1xf32> to vector<8x32xf32>
    %23 = arith.subf %14, %22 : vector<8x32xf32>
    %cst_3 = arith.constant -16.1180954 : f32
    %24 = vector.broadcast %cst_3 : f32 to vector<8x32xf32>
    %25 = arith.maximumf %23, %24 : vector<8x32xf32>
    %c0_4 = arith.constant 0 : index
    %c0_5 = arith.constant 0 : index
    %26 = vector.load %arg2[%c0_4, %c0_5] : memref<8x1xi32, #tpu.memory_space<vmem>>, vector<8x1xi32>
    %27 = tpu.iota {dimensions = array<i32: 1>} : vector<8x32xi32>
    %28 = vector.broadcast %26 : vector<8x1xi32> to vector<8x32xi32>
    %29 = arith.cmpi eq, %27, %28 : vector<8x32xi32>
    %30 = arith.extui %29 : vector<8x32xi1> to vector<8x32xi32>
    %31 = arith.sitofp %30 : vector<8x32xi32> to vector<8x32xf32>
    %cst_6 = arith.constant -0.356674939 : f32
    %32 = vector.broadcast %cst_6 : f32 to vector<8x32xf32>
    %33 = arith.addf %23, %32 : vector<8x32xf32>
    %cst_7 = arith.constant -16.1180954 : f32
    %34 = vector.broadcast %cst_7 : f32 to vector<8x32xf32>
    %35 = arith.maximumf %33, %34 : vector<8x32xf32>
    %36 = arith.mulf %31, %20 : vector<8x32xf32>
    %cst_8 = arith.constant dense<0.000000e+00> : vector<8xf32>
    %37 = vector.multi_reduction <add>, %36, %cst_8 [1] : vector<8x32xf32> to vector<8xf32>
    %38 = vector.shape_cast %37 : vector<8xf32> to vector<8x1xf32>
    %39 = arith.mulf %31, %35 : vector<8x32xf32>
    %cst_9 = arith.constant dense<0.000000e+00> : vector<8xf32>
    %40 = vector.multi_reduction <add>, %39, %cst_9 [1] : vector<8x32xf32> to vector<8xf32>
    %41 = vector.shape_cast %40 : vector<8xf32> to vector<8x1xf32>
    %cst_10 = arith.constant 0.699999988 : f32
    %42 = vector.broadcast %cst_10 : f32 to vector<8x1xf32>
    %43 = arith.mulf %42, %38 : vector<8x1xf32>
    %cst_11 = arith.constant 3.000000e-01 : f32
    %44 = vector.broadcast %cst_11 : f32 to vector<8x1xf32>
    %45 = arith.addf %44, %43 : vector<8x1xf32>
    %cst_12 = arith.constant 1.000000e-07 : f32
    %cst_13 = arith.constant 1.000000e+00 : f32
    %46 = vector.broadcast %cst_12 : f32 to vector<8x1xf32>
    %47 = arith.maximumf %46, %45 : vector<8x1xf32>
    %48 = vector.broadcast %cst_13 : f32 to vector<8x1xf32>
    %49 = arith.minimumf %48, %47 : vector<8x1xf32>
    %50 = math.log %49 : vector<8x1xf32>
    %cst_14 = arith.constant 0.000000e+00 : f32
    %51 = vector.broadcast %cst_14 : f32 to vector<8x1xf32>
    %52 = arith.subf %51, %50 : vector<8x1xf32>
    %53 = arith.subf %25, %35 : vector<8x32xf32>
    %54 = arith.mulf %20, %53 : vector<8x32xf32>
    %cst_15 = arith.constant dense<0.000000e+00> : vector<8xf32>
    %55 = vector.multi_reduction <add>, %54, %cst_15 [1] : vector<8x32xf32> to vector<8xf32>
    %56 = vector.shape_cast %55 : vector<8xf32> to vector<8x1xf32>
    %57 = arith.subf %41, %50 : vector<8x1xf32>
    %58 = arith.mulf %38, %57 : vector<8x1xf32>
    %59 = arith.addf %56, %58 : vector<8x1xf32>
    %cst_16 = arith.constant 1.20157421 : f32
    %60 = vector.broadcast %cst_16 : f32 to vector<8x1xf32>
    %61 = arith.mulf %60, %52 : vector<8x1xf32>
    %cst_17 = arith.constant 2.80367327 : f32
    %62 = vector.broadcast %cst_17 : f32 to vector<8x1xf32>
    %63 = arith.mulf %62, %59 : vector<8x1xf32>
    %64 = arith.addf %61, %63 : vector<8x1xf32>
    %cst_18 = arith.constant 0.000000e+00 : f32
    %65 = vector.broadcast %cst_18 : f32 to vector<8x1xf32>
    %66 = arith.select %6, %64, %65 : vector<8x1xi1>, vector<8x1xf32>
    %cst_19 = arith.constant dense<0.000000e+00> : vector<1xf32>
    %67 = vector.multi_reduction <add>, %66, %cst_19 [0] : vector<8x1xf32> to vector<1xf32>
    %68 = vector.shape_cast %67 : vector<1xf32> to vector<1x1xf32>
    %c0_i32 = arith.constant 0 : i32
    %69 = arith.cmpi eq, %arg0, %c0_i32 : i32
    %70 = arith.extui %69 : i1 to i32
    %c0_i32_20 = arith.constant 0 : i32
    %71 = arith.cmpi ne, %70, %c0_i32_20 : i32
    scf.if %71 {
      %cst_26 = arith.constant 0.000000e+00 : f32
      %78 = vector.broadcast %cst_26 : f32 to vector<1x1xf32>
      %c0_27 = arith.constant 0 : index
      %c0_28 = arith.constant 0 : index
      %79 = vector.load %arg3[%c0_27, %c0_28] : memref<1x1xf32, #tpu.memory_space<vmem>>, vector<1x1xf32>
      tpu.vector_store %arg3[%c0_27, %c0_28], %78 {strides = array<i32>} : memref<1x1xf32, #tpu.memory_space<vmem>>, vector<1x1xf32>,
    } else {
    }
    %c0_21 = arith.constant 0 : index
    %c0_22 = arith.constant 0 : index
    %72 = vector.load %arg3[%c0_21, %c0_22] : memref<1x1xf32, #tpu.memory_space<vmem>>, vector<1x1xf32>
    %73 = arith.addf %72, %68 : vector<1x1xf32>
    %c0_23 = arith.constant 0 : index
    %c0_24 = arith.constant 0 : index
    %74 = vector.load %arg3[%c0_23, %c0_24] : memref<1x1xf32, #tpu.memory_space<vmem>>, vector<1x1xf32>
    tpu.vector_store %arg3[%c0_23, %c0_24], %73 {strides = array<i32>} : memref<1x1xf32, #tpu.memory_space<vmem>>, vector<1x1xf32>,
    %c2_i32 = arith.constant 2 : i32
    %75 = arith.cmpi eq, %arg0, %c2_i32 : i32
    %76 = arith.extui %75 : i1 to i32
    %c0_i32_25 = arith.constant 0 : i32
    %77 = arith.cmpi ne, %76, %c0_i32_25 : i32
    scf.if %77 {
      %c0_26 = arith.constant 0 : index
      %c0_27 = arith.constant 0 : index
      %78 = vector.load %arg3[%c0_26, %c0_27] : memref<1x1xf32, #tpu.memory_space<vmem>>, vector<1x1xf32>
      %cst_28 = arith.constant 5.000000e-02 : f32
      %79 = vector.broadcast %cst_28 : f32 to vector<1x1xf32>
      %80 = arith.mulf %78, %79 : vector<1x1xf32>
      %c0_29 = arith.constant 0 : index
      %c0_30 = arith.constant 0 : index
      %81 = vector.load %arg3[%c0_29, %c0_30] : memref<1x1xf32, #tpu.memory_space<vmem>>, vector<1x1xf32>
      tpu.vector_store %arg3[%c0_29, %c0_30], %80 {strides = array<i32>} : memref<1x1xf32, #tpu.memory_space<vmem>>, vector<1x1xf32>,
    } else {
    }
    return
  }
  func.func @transform_0(%arg0: i32) -> (i32, i32) {
    %c0_i32 = arith.constant 0 : i32
    %c0_i32_0 = arith.constant 0 : i32
    return %arg0, %c0_i32 : i32, i32
  }
  func.func @transform_1(%arg0: i32) -> (i32, i32) {
    %c0_i32 = arith.constant 0 : i32
    %c0_i32_0 = arith.constant 0 : i32
    return %arg0, %c0_i32 : i32, i32
  }
  func.func @transform_2(%arg0: i32) -> (i32, i32) {
    %c0_i32 = arith.constant 0 : i32
    %c0_i32_0 = arith.constant 0 : i32
    %c0_i32_1 = arith.constant 0 : i32
    return %c0_i32, %c0_i32_0 : i32, i32
  }
}

</mosaic_0001>

<bundles_post_ra>
// kernel: tpu_custom_call.1
= control target key start
LH: loop header
LB: loop body
LE: loop exit
PB: predicated region body
PF: predicated region fallthrough
CT: control target
= control target key end

     0   :  { %7 = vsyncpa [#allocation3], 0  ;;  %s386_s9 = smov 0   ;;  %s434_s0 = inlined_call_operand.vmem [shape: f32[20,32], index: 0, kind: input, shape index: {}]   ;;  %s435_s1 = inlined_call_operand.vmem [shape: s32[20,1], index: 1, kind: input, shape index: {}]   ;;  %s436_s2 = inlined_call_operand.hbm [shape: f32[1,1], index: 2, kind: output, shape index: {}]  }
   0x1 LB: > { %s392_s10 = sadd.s32 4294967295, %s365_s9   ;;  %p292_p0 = scmp.ge.s32.totalorder %s365_s9, 1  ;;  %s365_s9 = sphi %s386_s9, %s13_s9  }
   0x2   : > { %p116_p1 = scmp.lt.s32.totalorder %s365_s9, 4 }
   0x4   : > { %p117_p2 = pnand %p292_p0, %p116_p1 }
   0x5   : > { %p136_p3 = scmp.lt.s32.totalorder (!%p117_p2), %s392_s10, 2  ;;  %s295_s11 = sshll.u32 (!%p117_p2), %s392_s10, 3 }
   0x6   : > { %120 = sbr.rel (%p117_p2) target bundleno = 555 (0x22b), region = 28  ;;  %p297_p4 = scmp.ne.s32.totalorder (!%p117_p2), %s392_s10, 0 }
   0xb   : > { %v145_v0 = vlaneseq  ;;  %v148_v1 = vstv %s295_s11  ;;  %s137_s12 = scalar_select %p136_p3, %s392_s10, 2  ;;  %vm154_vm0 = vcmask 261120   ;;  %v367_v7 = vmov 0  }
   0xc   : > { %321 = vset.pattern.permute.xlu1 %v367_v7  ;;  %322 = vset.pattern.permute.xlu0 %v367_v7  ;;  %v368_v18 = vmov 0.0  }
   0xd   : > { %v146_v2 = vshrl.u32 %v145_v0, 7  ;;  %s293_s13 = sshll.u32 %s137_s12, 3  ;;  %v172_v15 = vand.u32 127, %v145_v0 }
   0xe   : > { %s139_s16 = scalar_lea.vmem %s434_s0, %s293_s13  ;;  %s143_s19 = scalar_lea.vmem %s435_s1, %s293_s13 }
   0xf   : > { %v399_v3 = vadd.s32 %v148_v1, %v146_v2  ;;  %v144_v4 = vld [vmem:[%s139_s16] sm:$0xff] }
  0x10   : > { %v170_v8 = vld [vmem:[%s143_s19] sm:$0xff] }
  0x11   : > { %vm150_vm1 = vcmp.lt.s32.totalorder %v399_v3, 20  ;;  %174 = vperm.xlu1 %321, %v170_v8  }
  0x12   : > { %v153_v5 = vsel %vm150_vm1, %v144_v4, 0.0 }
  0x13   : > { %v155_v6 = vsel %vm154_vm0, %v153_v5, -inf }
  0x14   : > { %156 = vmax.xlane.f32.xlu0 %v155_v6 }
  0x8c   : > { %v175_v16 = vpop.permute.xlu1 %174 }
  0x8d   : > { %vm176_vm2 = vcmp.eq.s32.totalorder %v172_v15, %v175_v16 }
  0x8e   : > { %v296_v19 = vsel %vm176_vm2, 1.0, %v368_v18 }
  0x9d   : > { %v157_v9 = vpop.xlane.xlu0 %156 }
  0x9e   : > { %v158_v10 = vsub.f32 %v153_v5, %v157_v9 }
  0xa0   : > { %v159_v11 = vmul.f32 1.442695, %v158_v10 }
  0xa2   : > { %323 = vpow2.f32 %v159_v11 }
  0xaf   : > { %v324_v12 = vpop.eup %323 }
  0xb0   : > { %v161_v13 = vsel %vm154_vm0, %v324_v12, 0.0 }
  0xb1   : > { %162 = vadd.xlane.f32.xlu0 %v161_v13 }
 0x13a   : > { %v163_v14 = vpop.xlane.xlu0 %162 }
 0x13b   : > { %325 = vrcp.f32 %v163_v14 }
 0x13c   : > { %327 = vlog2.f32 %v163_v14 }
 0x148   : > { %v326_v17 = vpop.eup %325 }
 0x149   : > { %v328_v20 = vpop.eup %327  ;;  %v165_v21 = vmul.f32 %v326_v17, %v324_v12 }
 0x14a   : > { %v167_v22 = vmul.f32 0.6931472, %v328_v20 }
 0x14b   : > { %v181_v23 = vmul.f32 %v296_v19, %v165_v21 }
 0x14c   : > { %v168_v24 = vsub.f32 %v158_v10, %v167_v22 }
 0x14d   : > { %v182_v25 = vsel %vm154_vm0, %v181_v23, 0.0 }
 0x14e   : > { %183 = vadd.xlane.f32.xlu1 %v182_v25  ;;  %v179_v26 = vadd.f32 -0.35667494, %v168_v24  ;;  %v169_v28 = vmax.f32 %v168_v24, -16.118095 }
 0x150   : > { %v180_v27 = vmax.f32 %v179_v26, -16.118095 }
 0x152   : > { %v185_v29 = vmul.f32 %v296_v19, %v180_v27  ;;  %v196_v30 = vsub.f32 %v169_v28, %v180_v27 }
 0x154   : > { %v186_v31 = vsel %vm154_vm0, %v185_v29, 0.0  ;;  %v197_v32 = vmul.f32 %v196_v30, %v165_v21 }
 0x155   : > { %187 = vadd.xlane.f32.xlu0 %v186_v31 }
 0x156   : > { %v198_v33 = vsel %vm154_vm0, %v197_v32, 0.0 }
 0x159   : > { %199 = vadd.xlane.f32.xlu0 %v198_v33 }
 0x1d7   : > { %v184_v34 = vpop.xlane.xlu1 %183 }
 0x1d8   : > { %v189_v35 = vmul.f32 0.7, %v184_v34 }
 0x1da   : > { %v190_v36 = vadd.f32 0.3, %v189_v35 }
 0x1dc   : > { %v191_v37 = vmax.f32 %v190_v36, 1e-07 }
 0x1de   : > { %v192_v38 = vmin.f32 %v191_v37, 1.0  ;;  %v188_v40 = vpop.xlane.xlu0 %187 }
 0x1e0   : > { %329 = vlog2.f32 %v192_v38 }
 0x1e2   : > { %v200_v45 = vpop.xlane.xlu0 %199 }
 0x1ed   : > { %v330_v39 = vpop.eup %329 }
 0x1ee   : > { %v194_v41 = vmul.f32 0.6931472, %v330_v39 }
 0x1f0   : > { %v201_v42 = vsub.f32 %v188_v40, %v194_v41  ;;  %v195_v43 = vsub.f32 0.0, %v194_v41 }
 0x1f2   : > { %v202_v44 = vmul.f32 %v201_v42, %v184_v34  ;;  %v204_v47 = vmul.f32 1.2015742, %v195_v43 }
 0x1f4   : > { %v203_v46 = vadd.f32 %v202_v44, %v200_v45 }
 0x1f6   : > { %v205_v48 = vmul.f32 2.8036733, %v203_v46 }
 0x1f8   : > { %v206_v49 = vadd.f32 %v205_v48, %v204_v47 }
 0x1fa   : > { %v207_v50 = vsel %vm150_vm1, %v206_v49, 0.0 }
 0x1fb   : > { %v208_v51 = vrot.slane %v207_v50, 4 }
 0x1fd   : > { %v209_v52 = vadd.f32 %v208_v51, %v207_v50 }
 0x1ff   : > { %v210_v53 = vrot.slane %v209_v52, 2 }
 0x201   : > { %v211_v54 = vadd.f32 %v210_v53, %v209_v52  ;;  %217 = sbr.rel (%p297_p4) target bundleno = 520 (0x208), region = 32 }
 0x203   : > { %v212_v55 = vrot.slane %v211_v54, 1 }
 0x205   : > { %v213_v56 = vadd.f32 %v212_v55, %v211_v54 }
 0x206   : > { %vm218_vm3 = vcmask 0   ;;  %v369_v57 = vmov 0.0  }
 0x207   : > { %219 = vst.msk [vmem:[#allocation2] sm:$0x1] %vm218_vm3, %v369_v57 }
 0x208 PF: > { %vm222_vm4 = vcmask 0   ;;  %p298_p5 = scmp.ne.s32.totalorder %s392_s10, 2 }
 0x20d   : > { %227 = sbr.rel (%p298_p5) target bundleno = 540 (0x21c), region = 36 }
 0x20e   : > { %v220_v58 = vld [vmem:[#allocation2] sm:$0x1] }
 0x20f   : > { %v221_v59 = vadd.f32 %v220_v58, %v213_v56 }
 0x211   : > { %223 = vst.msk [vmem:[#allocation2] sm:$0x1] %vm222_vm4, %v221_v59 }
 0x218   : > { %v228_v60 = vld [vmem:[#allocation2] sm:$0x1] }
 0x219   : > { %v229_v61 = vmul.f32 0.05, %v228_v60 }
 0x21b   : > { %230 = vst.msk [vmem:[#allocation2] sm:$0x1] %vm222_vm4, %v229_v61 }
 0x21c PF: > { %p307_p6 = scmp.eq.s32.totalorder %s392_s10, 2  ;;  %s370_s20 = smov [#allocation2]  }
 0x21d   : > { %s238_s21 = sshll.u32 %s370_s20, 4  ;;  %s239_s21 = int_to_ptr.vmem [resolvable:$true] %s238_s21 }
 0x21e   : > { %s331_s22 = scalar_lea.vmem %s239_s21, 16  ;;  %s337_s23 = scalar_lea.vmem %s239_s21, 32 }
 0x21f   : > { %p332_p7 = scmp.ne.s32.totalorder %s239_s21, %s331_s22  ;;  %p338_p10 = scmp.lt.s32.totalorder %s239_s21, %s239_s21 }
 0x220   : > { %p339_p11 = scmp.lt.s32.totalorder %s337_s23, %s331_s22 }
 0x221   : > { %p333_p8 = pnand %p332_p7, %p307_p6 }
 0x222   : > { %p340_p12 = por %p339_p11, %p338_p10 }
 0x223   : > { %p334_p9 = pneg %p333_p8 }
 0x225   : > { %p341_p13 = pnand %p340_p12, %p334_p9 }
 0x227   : > { %344 = shalt.err (!%p341_p13)
}
 0x228   : > { %304 = dma.vmem_to_hbm [thread:$0]  (%p307_p6), %s239_s21, 16, %s436_s2, [#allocation3]  }
 0x229   : > { %360 = dma.done.wait (%p307_p6), [#allocation3], 16  }
 0x22a   : > { %362 = vsyncadd (%p307_p6), [#allocation3], 4294967280 }
 0x22b PF: > { %s13_s9 = sadd.s32 1, %s365_s9  }
 0x22c   : > { %p10_p0 = scmp.ge.s32.totalorder %s13_s9, 5  }
 0x22e   :  { %12 = sbr.rel (!%p10_p0) target bundleno = 1 (0x1), region = 66 }
 0x233   :  { %251 = vsyncpa [#allocation3], 1 }
 0x234   :  { %253 = vsyncpa [#allocation3 + $0x1], 1 }

</bundles_post_ra>
